<compile_context>
chip_gen: v5e
topology: v5e:2x2
jax: 0.10.0
libtpu: 0.0.40
codegen_flags: <defaults>
</compile_context>

<pallas_src>
import math

import jax
import jax.numpy as jnp
from jax.experimental import pallas as pl
from jax.experimental.pallas import tpu as pltpu


def _round_up(x, m):
    return ((x + m - 1) // m) * m


def _block_vmem_bytes(tile_b, in_feat, tn):
    # Double-buffered x / W / out blocks (+ tiny bias block), f32.
    return 4 * (2 * tile_b * in_feat + 2 * in_feat * tn + 2 * tile_b * tn + 2 * tn)


def _pick_tn(in_feat, out_feat, tile_b, budget_bytes):
    """Largest lane-dense (multiple-of-128) divisor of out_feat fitting VMEM."""
    if out_feat % 128 != 0:
        return out_feat                       # small / unaligned: one full tile
    cands = [out_feat] + [c for c in (2048, 1024, 512, 256, 128)
                          if c < out_feat and out_feat % c == 0]
    for c in cands:
        if _block_vmem_bytes(tile_b, in_feat, c) <= budget_bytes:
            return c
    return cands[-1]


def experts_kernel(tile_expert_ref, n_real_tiles_ref, x_ref, w_ref, b_ref, o_ref):
    # Grid = (num_n, num_t); t (row tiles) is the fast axis so the resident
    # weight block is reused across consecutive tiles of the same expert.
    t = pl.program_id(1)

    @pl.when(t < n_real_tiles_ref[0])        # skip MXU work on all-padding tiles
    def _():
        y = jnp.dot(x_ref[...], w_ref[0], preferred_element_type=jnp.float32)
        o_ref[...] = (y + b_ref[0, 0][None, :]).astype(o_ref.dtype)


def experts_forward(inputs, index, weight, bias):
    """inputs: (B, in) f32; index: (B,) int; weight: (E, in, out); bias: (E, out)."""
    B, in_feat = inputs.shape
    n_experts, _, out_feat = weight.shape
    index = index.astype(jnp.int32)

    # ---- tile sizes (re-derived for v5e / v6e / v7x VMEM budgets) ----------
    tile_b_cap = 256 if B >= 4096 else 128    # 256 fills the v6e/v7x MXU M dim
    tile_b = min(tile_b_cap, _round_up(B, 8))
    vmem_budget = 24 * 1024 * 1024            # fits v7x 64 MiB phys with headroom
    tn = _pick_tn(in_feat, out_feat, tile_b, vmem_budget)
    num_n = out_feat // tn

    # Worst case row tiles once each expert group is padded to a tile multiple:
    #   sum_e ceil(cnt_e / tile_b) <= ceil(B / tile_b) + E
    num_t = -(-B // tile_b) + n_experts
    padded_rows = num_t * tile_b

    # ---- route rows: group by expert, pad each group to a tile multiple ----
    eids = jnp.arange(n_experts, dtype=jnp.int32)
    counts = jnp.sum(index[:, None] == eids[None, :], axis=0).astype(jnp.int32)
    padded_counts = ((counts + tile_b - 1) // tile_b) * tile_b
    offsets = jnp.cumsum(counts) - counts                      # exclusive cumsum
    padded_offsets = jnp.cumsum(padded_counts) - padded_counts
    padded_ends = jnp.cumsum(padded_counts)

    sort_order = jnp.argsort(index)                            # rows grouped by expert
    sorted_eid = index[sort_order]
    rank_sorted = jnp.arange(B, dtype=jnp.int32) - offsets[sorted_eid]
    dest_sorted = padded_offsets[sorted_eid] + rank_sorted     # padded slot per sorted row
    dest = jnp.zeros((B,), jnp.int32).at[sort_order].set(dest_sorted)

    # Padded activations via a single row gather (padding slots read row 0;
    # their outputs are never read back).
    src = jnp.zeros((padded_rows,), jnp.int32).at[dest].set(
        jnp.arange(B, dtype=jnp.int32))
    x_padded = inputs[src]

    # ---- per-tile expert id + number of real tiles (scalar-prefetched) -----
    tile_starts = jnp.arange(num_t, dtype=jnp.int32) * tile_b
    tile_expert = jnp.clip(
        jnp.searchsorted(padded_ends, tile_starts, side="right"),
        0, n_experts - 1).astype(jnp.int32)
    n_real_t = (padded_ends[-1] // tile_b).astype(jnp.int32)
    # Re-point trailing all-padding tiles at the last real expert so they do
    # not trigger a fresh weight DMA (their compute is skipped anyway).
    last_real_e = tile_expert[jnp.clip(n_real_t - 1, 0, num_t - 1)]
    tile_expert = jnp.where(tile_starts < padded_ends[-1],
                            tile_expert, last_real_e).astype(jnp.int32)
    n_real_t = jnp.reshape(n_real_t, (1,))

    bias_r = bias.reshape(n_experts, 1, out_feat)

    cost = pl.CostEstimate(
        flops=2 * padded_rows * in_feat * out_feat,
        transcendentals=0,
        bytes_accessed=4 * (num_n * padded_rows * in_feat      # x re-read per n tile
                            + padded_rows * out_feat           # output
                            + n_experts * in_feat * out_feat   # each expert W once
                            + n_experts * out_feat),           # bias
    )
    vmem_limit = int(min(48 * 1024 * 1024,
                         max(16 * 1024 * 1024,
                             2 * _block_vmem_bytes(tile_b, in_feat, tn))))

    out_padded = pl.pallas_call(
        experts_kernel,
        out_shape=jax.ShapeDtypeStruct((padded_rows, out_feat), inputs.dtype),
        grid_spec=pltpu.PrefetchScalarGridSpec(
            num_scalar_prefetch=2,                  # tile_expert, n_real_tiles (SMEM)
            grid=(num_n, num_t),                    # t innermost -> weight reuse
            in_specs=[
                pl.BlockSpec((tile_b, in_feat), lambda n, t, te, nt: (t, 0)),
                pl.BlockSpec((1, in_feat, tn), lambda n, t, te, nt: (te[t], 0, n)),
                pl.BlockSpec((1, 1, tn), lambda n, t, te, nt: (te[t], 0, n)),
            ],
            out_specs=pl.BlockSpec((tile_b, tn), lambda n, t, te, nt: (t, n)),
        ),
        compiler_params=pltpu.CompilerParams(
            dimension_semantics=("parallel", "parallel"),   # no reduction axis
            vmem_limit_bytes=vmem_limit,
        ),
        cost_estimate=cost,
    )(tile_expert, n_real_t, x_padded, weight, bias_r)

    # Un-permute padded results back to the original row order (module contract).
    return out_padded[dest]


def init_params(key, n_experts, in_features, out_features):
    """Deterministic re-creation of the module's reset_parameters()."""
    kw, kb = jax.random.split(key)
    xavier_bound = math.sqrt(6.0 / (in_features + out_features))
    weight = jax.random.uniform(
        kw, (n_experts, in_features, out_features),
        minval=-xavier_bound, maxval=xavier_bound, dtype=jnp.float32)
    b_bound = 1.0 / math.sqrt(in_features)
    bias = jax.random.uniform(
        kb, (n_experts, out_features),
        minval=-b_bound, maxval=b_bound, dtype=jnp.float32)
    return weight, bias


if __name__ == "__main__":
    n_experts = 4
    in_features = 32
    out_features = 16
    batch = 8

    key = jax.random.PRNGKey(0)
    k_param, k_x, k_idx = jax.random.split(key, 3)

    weight, bias = init_params(k_param, n_experts, in_features, out_features)
    inputs = jax.random.normal(k_x, (batch, in_features), dtype=jnp.float32)
    index = jax.random.randint(k_idx, (batch,), 0, n_experts, dtype=jnp.int32)

    fwd = jax.jit(experts_forward)
    out = jax.block_until_ready(fwd(inputs, index, weight, bias))

    # Reference (mirrors torch.einsum('...i,...io->...o') + gathered bias).
    ref = jnp.einsum("bi,bio->bo", inputs, weight[index]) + bias[index]
    assert out.shape == (batch, out_features)
    # Tolerance accommodates MXU bf16-pass rounding differences between the
    # Pallas dot and the XLA einsum reference (both are f32 mathematically).
    assert jnp.allclose(out, ref, atol=2e-2, rtol=2e-2), "mismatch vs reference"

    print("KERNEL_OK")
</pallas_src>

<mosaic_0001>
module attributes {stable_mosaic.version = 11 : i64} {
  func.func @experts_kernel(%arg0: i32, %arg1: i32, %arg2: memref<5xi32, #tpu.memory_space<smem>>, %arg3: memref<1xi32, #tpu.memory_space<smem>>, %arg4: memref<8x32xf32, #tpu.memory_space<vmem>>, %arg5: memref<1x32x16xf32, #tpu.memory_space<vmem>>, %arg6: memref<1x1x16xf32, #tpu.memory_space<vmem>>, %arg7: memref<8x16xf32, #tpu.memory_space<vmem>>) attributes {dimension_semantics = [#tpu.dimension_semantics<parallel>, #tpu.dimension_semantics<parallel>], iteration_bounds = array<i64: 1, 5>, scalar_prefetch = 2 : i64, scratch_operands = 0 : i64, tpu.core_type = #tpu.core_type<tc>, window_params = [{transform_indices = @transform_0, window_bounds = array<i64: 8, 32>}, {transform_indices = @transform_1, window_bounds = array<i64: 1, 32, 16>}, {transform_indices = @transform_2, window_bounds = array<i64: 1, 1, 16>}, {transform_indices = @transform_3, window_bounds = array<i64: 8, 16>}]} {
    %c0 = arith.constant 0 : index
    %0 = memref.load %arg3[%c0] : memref<1xi32, #tpu.memory_space<smem>>
    %1 = arith.cmpi slt, %arg1, %0 : i32
    %2 = arith.extui %1 : i1 to i32
    %c0_i32 = arith.constant 0 : i32
    %3 = arith.cmpi ne, %2, %c0_i32 : i32
    scf.if %3 {
      %c0_0 = arith.constant 0 : index
      %c0_1 = arith.constant 0 : index
      %4 = vector.load %arg4[%c0_0, %c0_1] : memref<8x32xf32, #tpu.memory_space<vmem>>, vector<8x32xf32>
      %c0_2 = arith.constant 0 : index
      %c0_3 = arith.constant 0 : index
      %c0_4 = arith.constant 0 : index
      %5 = vector.load %arg5[%c0_2, %c0_3, %c0_4] : memref<1x32x16xf32, #tpu.memory_space<vmem>>, vector<1x32x16xf32>
      %6 = vector.shape_cast %5 : vector<1x32x16xf32> to vector<32x16xf32>
      %cst = arith.constant dense<0.000000e+00> : vector<8x16xf32>
      %7 = tpu.matmul %4, %6, %cst {dimension_numbers = #tpu.dot_dimension_numbers<[1], [0], [0], [1], [0, 0, 1, 1], [], []>} : vector<8x32xf32>, vector<32x16xf32>, vector<8x16xf32> -> vector<8x16xf32>
      %c0_5 = arith.constant 0 : index
      %c0_6 = arith.constant 0 : index
      %c0_7 = arith.constant 0 : index
      %8 = vector.load %arg6[%c0_5, %c0_6, %c0_7] : memref<1x1x16xf32, #tpu.memory_space<vmem>>, vector<1x1x16xf32>
      %9 = vector.shape_cast %8 : vector<1x1x16xf32> to vector<16xf32>
      %10 = vector.shape_cast %9 : vector<16xf32> to vector<1x16xf32>
      %11 = vector.broadcast %10 : vector<1x16xf32> to vector<8x16xf32>
      %12 = arith.addf %7, %11 : vector<8x16xf32>
      %c0_8 = arith.constant 0 : index
      %c0_9 = arith.constant 0 : index
      %13 = vector.load %arg7[%c0_8, %c0_9] : memref<8x16xf32, #tpu.memory_space<vmem>>, vector<8x16xf32>
      tpu.vector_store %arg7[%c0_8, %c0_9], %12 {strides = array<i32>} : memref<8x16xf32, #tpu.memory_space<vmem>>, vector<8x16xf32>,
    } else {
    }
    return
  }
  func.func @transform_0(%arg0: i32, %arg1: i32, %arg2: memref<5xi32, #tpu.memory_space<smem>>, %arg3: memref<1xi32, #tpu.memory_space<smem>>) -> (i32, i32) {
    %c0_i32 = arith.constant 0 : i32
    %c0_i32_0 = arith.constant 0 : i32
    return %arg1, %c0_i32 : i32, i32
  }
  func.func @transform_1(%arg0: i32, %arg1: i32, %arg2: memref<5xi32, #tpu.memory_space<smem>>, %arg3: memref<1xi32, #tpu.memory_space<smem>>) -> (i32, i32, i32) {
    %0 = arith.index_cast %arg1 : i32 to index
    %1 = memref.load %arg2[%0] : memref<5xi32, #tpu.memory_space<smem>>
    %c0_i32 = arith.constant 0 : i32
    %c0_i32_0 = arith.constant 0 : i32
    return %1, %c0_i32, %arg0 : i32, i32, i32
  }
  func.func @transform_2(%arg0: i32, %arg1: i32, %arg2: memref<5xi32, #tpu.memory_space<smem>>, %arg3: memref<1xi32, #tpu.memory_space<smem>>) -> (i32, i32, i32) {
    %0 = arith.index_cast %arg1 : i32 to index
    %1 = memref.load %arg2[%0] : memref<5xi32, #tpu.memory_space<smem>>
    %c0_i32 = arith.constant 0 : i32
    %c0_i32_0 = arith.constant 0 : i32
    return %1, %c0_i32, %arg0 : i32, i32, i32
  }
  func.func @transform_3(%arg0: i32, %arg1: i32, %arg2: memref<5xi32, #tpu.memory_space<smem>>, %arg3: memref<1xi32, #tpu.memory_space<smem>>) -> (i32, i32) {
    %c0_i32 = arith.constant 0 : i32
    return %arg1, %arg0 : i32, i32
  }
}

</mosaic_0001>

<bundles_post_ra>
// kernel: custom-call
= control target key start
LH: loop header
LB: loop body
LE: loop exit
PB: predicated region body
PF: predicated region fallthrough
CT: control target
= control target key end

     0   :  { %s6_s0 = inlined_call_operand.vmem [shape: u32[5], index: 0, kind: output, shape index: {}]  }

// kernel: experts_forward.1
= control target key start
LH: loop header
LB: loop body
LE: loop exit
PB: predicated region body
PF: predicated region fallthrough
CT: control target
= control target key end

     0   :  { %s486_s23 = smov [#allocation3]   ;;  %s562_s0 = inlined_call_operand.vmem [shape: s32[5], index: 0, kind: input, shape index: {}]   ;;  %s563_s1 = inlined_call_operand.<no memory space> [shape: s32[1], index: 1, kind: input, shape index: {}]   ;;  %s564_s2 = inlined_call_operand.vmem [shape: f32[40,32], index: 2, kind: input, shape index: {}]   ;;  %s565_s3 = inlined_call_operand.vmem [shape: f32[4,32,16], index: 3, kind: input, shape index: {}]   ;;  %s566_s4 = inlined_call_operand.vmem [shape: f32[4,1,16], index: 4, kind: input, shape index: {}]   ;;  %s567_s5 = inlined_call_operand.vmem [shape: f32[40,16], index: 5, kind: output, shape index: {}]  }
   0x1   :  { %s11_s20 = sshll.u32 %s562_s0, 4  ;;  %15 = sst [smem:[#allocation4]] %s563_s1  ;;  %s12_s20 = int_to_ptr.vmem [resolvable:$true] %s11_s20 }
   0x2   :  { %14 = dma.vmem_to_smem %s12_s20, 16, %s486_s23, [#allocation2] }
   0x3   :  { %472 = dma.done.wait [#allocation2], 16 }
   0x4   :  { %473 = vsyncadd [#allocation2], 4294967280 }
   0x5   :  { %18 = sfence }
   0x6   :  { %s523_s24 = smov 0   ;;  %s525_s25 = smov 0  }
   0x7   :  { %s527_s26 = smov 0  }
   0x8 LB: > { %s33_s0 = sadd.s32 1, %s480_s25  ;;  %p412_p0 = scmp.ge.s32.totalorder %s484_s26, 1  ;;  %s484_s26 = sphi %s527_s26, %s24_s26   ;;  %s480_s25 = sphi %s525_s25, %s569_s25   ;;  %s476_s24 = sphi %s523_s24, %s568_s24  }
   0x9   : > { %p34_p1 = scmp.ge.s32.totalorder %s33_s0, 5  ;;  %p197_p2 = scmp.lt.s32.totalorder %s484_s26, 6 }
   0xb   : > { %s571_s0 = smov (%p34_p1, %s33_s0), 0  ;;  %p198_p3 = pnand %p412_p0, %p197_p2 }
   0xc   : > { %p238_p4 = scmp.lt.s32.totalorder (!%p198_p3), %s476_s24, 4  ;;  %s242_s1 = sld [smem:[#allocation3 + %s476_s24]] (!%p198_p3) }
   0xd   : > { %201 = sbr.rel (%p198_p3) target bundleno = 166 (0xa6), region = 32  ;;  %s252_s27 = sld [smem:[#allocation3 + %s476_s24]] (!%p198_p3) }
   0xe   : > { %s267_s29 = sld [smem:[#allocation4]] (!%p198_p3) }
  0x12   : > { %s239_s28 = scalar_select %p238_p4, %s476_s24, 4 }
  0x13   : > { %p243_p5 = scmp.lt.s32.totalorder %s242_s1, 3  ;;  %p253_p6 = scmp.lt.s32.totalorder %s252_s27, 3 }
  0x14   : > { %s413_s30 = sshll.u32 %s239_s28, 3  ;;  %p417_p7 = scmp.ge.s32.totalorder %s476_s24, %s267_s29 }
  0x15   : > { %s241_s8 = scalar_lea.vmem %s564_s2, %s413_s30  ;;  %s266_s11 = scalar_lea.vmem %s567_s5, %s413_s30 }
  0x16   : > { %s573_s1 = smov (!%p243_p5, %s242_s1), 3  ;;  %s575_s27 = smov (!%p253_p6, %s252_s27), 3 }
  0x17   : > { %s421_s12 = sshll.u32 %s573_s1, 5  ;;  %s258_s18 = scalar_lea.vmem %s566_s4, %s575_s27 }
  0x18   : > { %s250_s15 = scalar_lea.vmem %s565_s3, %s421_s12  ;;  %271 = sbr.rel (%p417_p7) target bundleno = 166 (0xa6), region = 36 }
  0x1d   : > { %v276_v0 = vld [vmem:[%s250_s15 + $0x18] sm:$0xff]  ;;  %v275_v1 = vld [vmem:[%s250_s15 + $0x10] sm:$0xff]  ;;  %v274_v2 = vld [vmem:[%s250_s15 + $0x8] sm:$0xff]  ;;  %vm281_vm0 = vcmask 261120   ;;  %vm305_vm1 = vcmask 130048  }
  0x1e   : > { %297 = vmatpush.msra.mxu0 %v276_v0  ;;  %v273_v3 = vld [vmem:[%s250_s15] sm:$0xff] }
  0x1f   : > { %v272_v4 = vld [vmem:[%s241_s8] sm:$0xff] }
  0x20   : > { %298 = vmatpush.msra.mxu0 %v275_v1  ;;  %v447_v5 = vld [vmem:[%s258_s18] ss:$0 sm:$0xff] }
  0x22   : > { %299 = vmatpush.msra.mxu0 %v274_v2 }
  0x24   : > { %300 = vmatpush.msra.mxu0 %v273_v3 }
  0x25   : > { %418 = vmatmul.msk.f32.vlgmr.msra.gmra.mxu0 %vm281_vm0, %v272_v4 }
  0xa2   : > { %v302_v6 = vpop.f32.mrf.mxu0 }
  0xa3   : > { %v303_v7 = vadd.f32 %v447_v5, %v302_v6 }
  0xa5   : > { %306 = vst.msk [vmem:[%s266_s11] sm:$0xff] %vm305_vm1, %v303_v7 }
  0xa6 PF: > { %s24_s26 = sadd.s32 1, %s484_s26   ;;  %s568_s24 = smov %s480_s25 }
  0xa7   : > { %p21_p8 = scmp.ge.s32.totalorder %s24_s26, 7   ;;  %s569_s25 = smov %s571_s0 }
  0xa9   :  { %23 = sbr.rel (!%p21_p8) target bundleno = 8 (0x8), region = 72 }

</bundles_post_ra>
